<compile_context>
chip_gen: v7x
topology: tpu7x:2x2x1
jax: 0.10.0
libtpu: 0.0.40
codegen_flags: <defaults>
</compile_context>

<pallas_src>
import math
import jax
import jax.numpy as jnp
from jax.experimental import pallas as pl
from jax.experimental.pallas import tpu as pltpu


def _bf16_activations_default():
    """bf16 bias-add/tanh only where the VPU/EUP have a bf16 path (v6e / v7x)."""
    try:
        kind = jax.devices()[0].device_kind.lower()
    except Exception:
        return False
    return ("v6" in kind) or ("v7" in kind) or ("7x" in kind)


def _make_pinn_kernel(num_layers, sub_chunks, chunk_b, act_dtype):
    """Fused-MLP kernel body: feature-major, f32 MXU accumulation, chunked batch."""

    def kernel(*refs):
        # refs = (x_ref, w0, b0, w1, b1, ..., w_{L-1}, b_{L-1}, o_ref)
        x_ref = refs[0]
        o_ref = refs[-1]
        wb = refs[1:-1]

        # Load weights/biases once per grid step (hoisted out of the chunk loop).
        w_vals = [wb[2 * li][...] for li in range(num_layers)]
        b_vals = [wb[2 * li + 1][...] for li in range(num_layers)]
        # Hidden-layer biases participate in the (possibly bf16) bias-add/tanh;
        # the last layer's bias-add stays in f32.
        b_hidden = [b.astype(act_dtype) for b in b_vals[:-1]]
        b_last = b_vals[-1].astype(jnp.float32)

        # Independent batch sub-chunks: separate matmul->tanh dependence chains so
        # MXU / VPU / EUP overlap and vreg live ranges stay bounded.
        for c in range(sub_chunks):
            sl = slice(c * chunk_b, (c + 1) * chunk_b)
            h = x_ref[:, sl]                                    # [in0, chunk_b] f32
            for li in range(num_layers):
                w = w_vals[li]                                  # [out_i, in_i]
                acc = jnp.dot(w, h.astype(w.dtype),
                              preferred_element_type=jnp.float32)
                if li != num_layers - 1:
                    # bias-add + tanh in act_dtype (bf16 on v6e/v7x, f32 on v5e).
                    h = jnp.tanh(acc.astype(act_dtype) + b_hidden[li])
                else:
                    h = acc + b_last                            # f32
            o_ref[:, sl] = h.astype(o_ref.dtype)                # lane-dense store

    return kernel


def pinn_forward(x, weights, biases, *, tile_b=4096, sub_chunks=4,
                 mixed_precision=True, first_layer_f32=True,
                 bf16_activations=None,
                 x_feature_major=False, return_feature_major=False):
    """Fused PINN forward pass.

    x:       [batch, in_dim] (or [in_dim, batch] if x_feature_major) float32.
    weights: list of [out_i, in_i] float32 (native PyTorch nn.Linear layout).
    biases:  list of [out_i]       float32.
    Returns  [batch, out_dim] float32 (or [out_dim, batch] if return_feature_major).
    """
    assert len(weights) == len(biases)
    num_layers = len(weights)

    if x_feature_major:
        in_dim, batch = x.shape
        xT = x
    else:
        batch, in_dim = x.shape
        # TODO(synk): at >=64K points prefer feature-major I/O end-to-end; this
        # transpose (and the one on the way out) is a full HBM round-trip in XLA.
        xT = x.T                                               # [in_dim, batch]
    out_dim = weights[-1].shape[0]

    if bf16_activations is None:
        bf16_activations = mixed_precision and _bf16_activations_default()
    act_dtype = jnp.bfloat16 if (mixed_precision and bf16_activations) else jnp.float32
    w_dtype = jnp.bfloat16 if mixed_precision else jnp.float32

    # ---- tile selection: lane-aligned, multiple of 256; pad batch in-wrapper ----
    LANE_Q = 256
    padded_min = ((batch + LANE_Q - 1) // LANE_Q) * LANE_Q
    tile_b = max(LANE_Q, min(int(tile_b), padded_min))
    tile_b = (tile_b // LANE_Q) * LANE_Q
    padded_batch = ((batch + tile_b - 1) // tile_b) * tile_b

    # Sub-chunking: each chunk stays a multiple of 128 lanes.
    sc = max(1, min(int(sub_chunks), tile_b // 128))
    while sc > 1 and (tile_b % sc != 0 or (tile_b // sc) % 128 != 0):
        sc -= 1
    chunk_b = tile_b // sc

    xT = xT.astype(jnp.float32)
    if padded_batch != batch:
        xT = jnp.pad(xT, ((0, 0), (0, padded_batch - batch)))

    # Weight/bias prep. Layer 0 stays f32 in mixed precision so the coordinates
    # are not truncated to bf16 before the first matmul.
    ws, bs = [], []
    for i, (w, b) in enumerate(zip(weights, biases)):
        wdt = jnp.float32 if (mixed_precision and first_layer_f32 and i == 0) else w_dtype
        ws.append(w.astype(wdt))                               # [out_i, in_i]
        bs.append(b.reshape(-1, 1).astype(jnp.float32))        # [out_i, 1]

    kernel = _make_pinn_kernel(num_layers, sc, chunk_b, act_dtype)

    # Grid only over batch tiles; weights/biases use constant block indices so they
    # are fetched once and stay VMEM-resident across grid steps.
    in_specs = [pl.BlockSpec((in_dim, tile_b), lambda i: (0, i))]
    operands = [xT]
    for w, b in zip(ws, bs):
        in_specs.append(pl.BlockSpec(w.shape, lambda i: (0, 0)))
        in_specs.append(pl.BlockSpec(b.shape, lambda i: (0, 0)))
        operands.append(w)
        operands.append(b)

    out_specs = pl.BlockSpec((out_dim, tile_b), lambda i: (0, i))

    outT = pl.pallas_call(
        kernel,
        out_shape=jax.ShapeDtypeStruct((out_dim, padded_batch), jnp.float32),
        grid_spec=pltpu.PrefetchScalarGridSpec(
            num_scalar_prefetch=0,
            grid=(padded_batch // tile_b,),
            in_specs=in_specs,
            out_specs=out_specs,
        ),
        compiler_params=pltpu.CompilerParams(
            dimension_semantics=("parallel",)),
    )(*operands)

    outT = outT[:, :batch]
    return outT if return_feature_major else outT.T            # [batch, out_dim]


def init_pinn_params(layers, key):
    """Xavier-normal weights ([out, in], PyTorch layout), zero biases (as in the module)."""
    weights, biases = [], []
    for i in range(len(layers) - 1):
        fan_in, fan_out = layers[i], layers[i + 1]
        key, sub = jax.random.split(key)
        std = math.sqrt(2.0 / (fan_in + fan_out))
        w = std * jax.random.normal(sub, (fan_out, fan_in), dtype=jnp.float32)
        b = jnp.zeros((fan_out,), dtype=jnp.float32)
        weights.append(w)
        biases.append(b)
    return weights, biases


def pinn_reference(x, weights, biases, *, mixed_precision=False,
                   first_layer_f32=True, bf16_activations=False):
    """Pure-JAX reference of the PyTorch forward(); can mirror the kernel's precision."""
    num_layers = len(weights)
    w_dtype = jnp.bfloat16 if mixed_precision else jnp.float32
    act_dtype = jnp.bfloat16 if (mixed_precision and bf16_activations) else jnp.float32
    h = x.astype(jnp.float32).T                                 # feature-major
    for i, (w, b) in enumerate(zip(weights, biases)):
        wdt = jnp.float32 if (mixed_precision and first_layer_f32 and i == 0) else w_dtype
        acc = jnp.dot(w.astype(wdt), h.astype(wdt),
                      preferred_element_type=jnp.float32)
        if i != num_layers - 1:
            h = jnp.tanh(acc.astype(act_dtype) + b.reshape(-1, 1).astype(act_dtype))
        else:
            h = acc + b.reshape(-1, 1).astype(jnp.float32)
    return h.T.astype(jnp.float32)


if __name__ == "__main__":
    # Typical 3D PINN architecture: (x, y, z, t) -> 3 hidden layers of 32 -> 3 outputs.
    layers = [4, 32, 32, 32, 3]

    key = jax.random.PRNGKey(0)
    key, pkey = jax.random.split(key)
    weights, biases = init_pinn_params(layers, pkey)
    # The module zero-inits biases; perturb them here so the test exercises the bias path.
    bkeys = jax.random.split(key, len(biases) + 1)
    key = bkeys[0]
    biases = [b + 0.1 * jax.random.normal(k, b.shape, dtype=jnp.float32)
              for b, k in zip(biases, bkeys[1:])]

    bf16_act = _bf16_activations_default()

    # ---- Case 1: batch not tile-aligned (exercises wrapper-side padding), mixed precision ----
    b1 = 1000
    key, xk = jax.random.split(key)
    x1 = jax.random.normal(xk, (b1, layers[0]), dtype=jnp.float32)
    out1 = jax.block_until_ready(
        pinn_forward(x1, weights, biases, mixed_precision=True,
                     bf16_activations=bf16_act))
    assert out1.shape == (b1, layers[-1])

    ref1_mirror = pinn_reference(x1, weights, biases, mixed_precision=True,
                                 first_layer_f32=True, bf16_activations=bf16_act)
    ref1_f32 = pinn_reference(x1, weights, biases, mixed_precision=False)
    tol_m = 3e-2 if bf16_act else 3e-3
    assert jnp.allclose(out1, ref1_mirror, atol=tol_m, rtol=tol_m), \
        "mismatch vs precision-mirrored reference"
    assert jnp.allclose(out1, ref1_f32, atol=1e-1, rtol=1e-1), \
        "mismatch vs f32 reference (sanity)"

    # ---- Case 2: multi-step grid (2 tiles -> both v7x TCs busy), pure-f32 tight check ----
    b2 = 8192
    key, xk = jax.random.split(key)
    x2 = jax.random.normal(xk, (b2, layers[0]), dtype=jnp.float32)
    out2 = jax.block_until_ready(
        pinn_forward(x2, weights, biases, tile_b=4096, sub_chunks=4,
                     mixed_precision=False, bf16_activations=False))
    assert out2.shape == (b2, layers[-1])
    ref2 = pinn_reference(x2, weights, biases, mixed_precision=False)
    assert jnp.allclose(out2, ref2, atol=1e-4, rtol=1e-4), "f32 path mismatch"

    print("KERNEL_OK")
</pallas_src>

<mosaic_0001>
module attributes {stable_mosaic.version = 11 : i64} {
  func.func @kernel(%arg0: i32, %arg1: memref<4x1024xf32, #tpu.memory_space<vmem>>, %arg2: memref<32x4xf32, #tpu.memory_space<vmem>>, %arg3: memref<32x1xf32, #tpu.memory_space<vmem>>, %arg4: memref<32x32xbf16, #tpu.memory_space<vmem>>, %arg5: memref<32x1xf32, #tpu.memory_space<vmem>>, %arg6: memref<32x32xbf16, #tpu.memory_space<vmem>>, %arg7: memref<32x1xf32, #tpu.memory_space<vmem>>, %arg8: memref<3x32xbf16, #tpu.memory_space<vmem>>, %arg9: memref<3x1xf32, #tpu.memory_space<vmem>>, %arg10: memref<3x1024xf32, #tpu.memory_space<vmem>>) attributes {dimension_semantics = [#tpu.dimension_semantics<parallel>], iteration_bounds = array<i64: 1>, scalar_prefetch = 0 : i64, scratch_operands = 0 : i64, tpu.core_type = #tpu.core_type<tc>, window_params = [{transform_indices = @transform_0, window_bounds = array<i64: 4, 1024>}, {pipeline_mode = #tpu.pipeline_mode<synchronous>, transform_indices = @transform_1, window_bounds = array<i64: 32, 4>}, {pipeline_mode = #tpu.pipeline_mode<synchronous>, transform_indices = @transform_2, window_bounds = array<i64: 32, 1>}, {pipeline_mode = #tpu.pipeline_mode<synchronous>, transform_indices = @transform_3, window_bounds = array<i64: 32, 32>}, {pipeline_mode = #tpu.pipeline_mode<synchronous>, transform_indices = @transform_4, window_bounds = array<i64: 32, 1>}, {pipeline_mode = #tpu.pipeline_mode<synchronous>, transform_indices = @transform_5, window_bounds = array<i64: 32, 32>}, {pipeline_mode = #tpu.pipeline_mode<synchronous>, transform_indices = @transform_6, window_bounds = array<i64: 32, 1>}, {pipeline_mode = #tpu.pipeline_mode<synchronous>, transform_indices = @transform_7, window_bounds = array<i64: 3, 32>}, {pipeline_mode = #tpu.pipeline_mode<synchronous>, transform_indices = @transform_8, window_bounds = array<i64: 3, 1>}, {transform_indices = @transform_9, window_bounds = array<i64: 3, 1024>}]} {
    %c0 = arith.constant 0 : index
    %c0_0 = arith.constant 0 : index
    %0 = vector.load %arg2[%c0, %c0_0] : memref<32x4xf32, #tpu.memory_space<vmem>>, vector<32x4xf32>
    %c0_1 = arith.constant 0 : index
    %c0_2 = arith.constant 0 : index
    %1 = vector.load %arg4[%c0_1, %c0_2] : memref<32x32xbf16, #tpu.memory_space<vmem>>, vector<32x32xbf16>
    %c0_3 = arith.constant 0 : index
    %c0_4 = arith.constant 0 : index
    %2 = vector.load %arg6[%c0_3, %c0_4] : memref<32x32xbf16, #tpu.memory_space<vmem>>, vector<32x32xbf16>
    %c0_5 = arith.constant 0 : index
    %c0_6 = arith.constant 0 : index
    %3 = vector.load %arg8[%c0_5, %c0_6] : memref<3x32xbf16, #tpu.memory_space<vmem>>, vector<3x32xbf16>
    %c0_7 = arith.constant 0 : index
    %c0_8 = arith.constant 0 : index
    %4 = vector.load %arg3[%c0_7, %c0_8] : memref<32x1xf32, #tpu.memory_space<vmem>>, vector<32x1xf32>
    %c0_9 = arith.constant 0 : index
    %c0_10 = arith.constant 0 : index
    %5 = vector.load %arg5[%c0_9, %c0_10] : memref<32x1xf32, #tpu.memory_space<vmem>>, vector<32x1xf32>
    %c0_11 = arith.constant 0 : index
    %c0_12 = arith.constant 0 : index
    %6 = vector.load %arg7[%c0_11, %c0_12] : memref<32x1xf32, #tpu.memory_space<vmem>>, vector<32x1xf32>
    %c0_13 = arith.constant 0 : index
    %c0_14 = arith.constant 0 : index
    %7 = vector.load %arg9[%c0_13, %c0_14] : memref<3x1xf32, #tpu.memory_space<vmem>>, vector<3x1xf32>
    %c0_15 = arith.constant 0 : index
    %c0_16 = arith.constant 0 : index
    %8 = vector.load %arg1[%c0_15, %c0_16] : memref<4x1024xf32, #tpu.memory_space<vmem>>, vector<4x256xf32>
    %cst = arith.constant dense<0.000000e+00> : vector<32x256xf32>
    %9 = tpu.matmul %0, %8, %cst {dimension_numbers = #tpu.dot_dimension_numbers<[1], [0], [0], [1], [0, 0, 1, 1], [], []>} : vector<32x4xf32>, vector<4x256xf32>, vector<32x256xf32> -> vector<32x256xf32>
    %10 = vector.broadcast %4 : vector<32x1xf32> to vector<32x256xf32>
    %11 = arith.addf %9, %10 : vector<32x256xf32>
    %12 = math.tanh %11 : vector<32x256xf32>
    %13 = arith.truncf %12 : vector<32x256xf32> to vector<32x256xbf16>
    %cst_17 = arith.constant dense<0.000000e+00> : vector<32x256xf32>
    %14 = tpu.matmul %1, %13, %cst_17 {dimension_numbers = #tpu.dot_dimension_numbers<[1], [0], [0], [1], [0, 0, 1, 1], [], []>} : vector<32x32xbf16>, vector<32x256xbf16>, vector<32x256xf32> -> vector<32x256xf32>
    %15 = vector.broadcast %5 : vector<32x1xf32> to vector<32x256xf32>
    %16 = arith.addf %14, %15 : vector<32x256xf32>
    %17 = math.tanh %16 : vector<32x256xf32>
    %18 = arith.truncf %17 : vector<32x256xf32> to vector<32x256xbf16>
    %cst_18 = arith.constant dense<0.000000e+00> : vector<32x256xf32>
    %19 = tpu.matmul %2, %18, %cst_18 {dimension_numbers = #tpu.dot_dimension_numbers<[1], [0], [0], [1], [0, 0, 1, 1], [], []>} : vector<32x32xbf16>, vector<32x256xbf16>, vector<32x256xf32> -> vector<32x256xf32>
    %20 = vector.broadcast %6 : vector<32x1xf32> to vector<32x256xf32>
    %21 = arith.addf %19, %20 : vector<32x256xf32>
    %22 = math.tanh %21 : vector<32x256xf32>
    %23 = arith.truncf %22 : vector<32x256xf32> to vector<32x256xbf16>
    %cst_19 = arith.constant dense<0.000000e+00> : vector<3x256xf32>
    %24 = tpu.matmul %3, %23, %cst_19 {dimension_numbers = #tpu.dot_dimension_numbers<[1], [0], [0], [1], [0, 0, 1, 1], [], []>} : vector<3x32xbf16>, vector<32x256xbf16>, vector<3x256xf32> -> vector<3x256xf32>
    %25 = vector.broadcast %7 : vector<3x1xf32> to vector<3x256xf32>
    %26 = arith.addf %24, %25 : vector<3x256xf32>
    %c0_20 = arith.constant 0 : index
    %c0_21 = arith.constant 0 : index
    %27 = vector.load %arg10[%c0_20, %c0_21] : memref<3x1024xf32, #tpu.memory_space<vmem>>, vector<3x256xf32>
    tpu.vector_store %arg10[%c0_20, %c0_21], %26 {strides = array<i32>} : memref<3x1024xf32, #tpu.memory_space<vmem>>, vector<3x256xf32>,
    %c0_22 = arith.constant 0 : index
    %c256 = arith.constant 256 : index
    %28 = vector.load %arg1[%c0_22, %c256] : memref<4x1024xf32, #tpu.memory_space<vmem>>, vector<4x256xf32>
    %cst_23 = arith.constant dense<0.000000e+00> : vector<32x256xf32>
    %29 = tpu.matmul %0, %28, %cst_23 {dimension_numbers = #tpu.dot_dimension_numbers<[1], [0], [0], [1], [0, 0, 1, 1], [], []>} : vector<32x4xf32>, vector<4x256xf32>, vector<32x256xf32> -> vector<32x256xf32>
    %30 = vector.broadcast %4 : vector<32x1xf32> to vector<32x256xf32>
    %31 = arith.addf %29, %30 : vector<32x256xf32>
    %32 = math.tanh %31 : vector<32x256xf32>
    %33 = arith.truncf %32 : vector<32x256xf32> to vector<32x256xbf16>
    %cst_24 = arith.constant dense<0.000000e+00> : vector<32x256xf32>
    %34 = tpu.matmul %1, %33, %cst_24 {dimension_numbers = #tpu.dot_dimension_numbers<[1], [0], [0], [1], [0, 0, 1, 1], [], []>} : vector<32x32xbf16>, vector<32x256xbf16>, vector<32x256xf32> -> vector<32x256xf32>
    %35 = vector.broadcast %5 : vector<32x1xf32> to vector<32x256xf32>
    %36 = arith.addf %34, %35 : vector<32x256xf32>
    %37 = math.tanh %36 : vector<32x256xf32>
    %38 = arith.truncf %37 : vector<32x256xf32> to vector<32x256xbf16>
    %cst_25 = arith.constant dense<0.000000e+00> : vector<32x256xf32>
    %39 = tpu.matmul %2, %38, %cst_25 {dimension_numbers = #tpu.dot_dimension_numbers<[1], [0], [0], [1], [0, 0, 1, 1], [], []>} : vector<32x32xbf16>, vector<32x256xbf16>, vector<32x256xf32> -> vector<32x256xf32>
    %40 = vector.broadcast %6 : vector<32x1xf32> to vector<32x256xf32>
    %41 = arith.addf %39, %40 : vector<32x256xf32>
    %42 = math.tanh %41 : vector<32x256xf32>
    %43 = arith.truncf %42 : vector<32x256xf32> to vector<32x256xbf16>
    %cst_26 = arith.constant dense<0.000000e+00> : vector<3x256xf32>
    %44 = tpu.matmul %3, %43, %cst_26 {dimension_numbers = #tpu.dot_dimension_numbers<[1], [0], [0], [1], [0, 0, 1, 1], [], []>} : vector<3x32xbf16>, vector<32x256xbf16>, vector<3x256xf32> -> vector<3x256xf32>
    %45 = vector.broadcast %7 : vector<3x1xf32> to vector<3x256xf32>
    %46 = arith.addf %44, %45 : vector<3x256xf32>
    %c0_27 = arith.constant 0 : index
    %c256_28 = arith.constant 256 : index
    %47 = vector.load %arg10[%c0_27, %c256_28] : memref<3x1024xf32, #tpu.memory_space<vmem>>, vector<3x256xf32>
    tpu.vector_store %arg10[%c0_27, %c256_28], %46 {strides = array<i32>} : memref<3x1024xf32, #tpu.memory_space<vmem>>, vector<3x256xf32>,
    %c0_29 = arith.constant 0 : index
    %c512 = arith.constant 512 : index
    %48 = vector.load %arg1[%c0_29, %c512] : memref<4x1024xf32, #tpu.memory_space<vmem>>, vector<4x256xf32>
    %cst_30 = arith.constant dense<0.000000e+00> : vector<32x256xf32>
    %49 = tpu.matmul %0, %48, %cst_30 {dimension_numbers = #tpu.dot_dimension_numbers<[1], [0], [0], [1], [0, 0, 1, 1], [], []>} : vector<32x4xf32>, vector<4x256xf32>, vector<32x256xf32> -> vector<32x256xf32>
    %50 = vector.broadcast %4 : vector<32x1xf32> to vector<32x256xf32>
    %51 = arith.addf %49, %50 : vector<32x256xf32>
    %52 = math.tanh %51 : vector<32x256xf32>
    %53 = arith.truncf %52 : vector<32x256xf32> to vector<32x256xbf16>
    %cst_31 = arith.constant dense<0.000000e+00> : vector<32x256xf32>
    %54 = tpu.matmul %1, %53, %cst_31 {dimension_numbers = #tpu.dot_dimension_numbers<[1], [0], [0], [1], [0, 0, 1, 1], [], []>} : vector<32x32xbf16>, vector<32x256xbf16>, vector<32x256xf32> -> vector<32x256xf32>
    %55 = vector.broadcast %5 : vector<32x1xf32> to vector<32x256xf32>
    %56 = arith.addf %54, %55 : vector<32x256xf32>
    %57 = math.tanh %56 : vector<32x256xf32>
    %58 = arith.truncf %57 : vector<32x256xf32> to vector<32x256xbf16>
    %cst_32 = arith.constant dense<0.000000e+00> : vector<32x256xf32>
    %59 = tpu.matmul %2, %58, %cst_32 {dimension_numbers = #tpu.dot_dimension_numbers<[1], [0], [0], [1], [0, 0, 1, 1], [], []>} : vector<32x32xbf16>, vector<32x256xbf16>, vector<32x256xf32> -> vector<32x256xf32>
    %60 = vector.broadcast %6 : vector<32x1xf32> to vector<32x256xf32>
    %61 = arith.addf %59, %60 : vector<32x256xf32>
    %62 = math.tanh %61 : vector<32x256xf32>
    %63 = arith.truncf %62 : vector<32x256xf32> to vector<32x256xbf16>
    %cst_33 = arith.constant dense<0.000000e+00> : vector<3x256xf32>
    %64 = tpu.matmul %3, %63, %cst_33 {dimension_numbers = #tpu.dot_dimension_numbers<[1], [0], [0], [1], [0, 0, 1, 1], [], []>} : vector<3x32xbf16>, vector<32x256xbf16>, vector<3x256xf32> -> vector<3x256xf32>
    %65 = vector.broadcast %7 : vector<3x1xf32> to vector<3x256xf32>
    %66 = arith.addf %64, %65 : vector<3x256xf32>
    %c0_34 = arith.constant 0 : index
    %c512_35 = arith.constant 512 : index
    %67 = vector.load %arg10[%c0_34, %c512_35] : memref<3x1024xf32, #tpu.memory_space<vmem>>, vector<3x256xf32>
    tpu.vector_store %arg10[%c0_34, %c512_35], %66 {strides = array<i32>} : memref<3x1024xf32, #tpu.memory_space<vmem>>, vector<3x256xf32>,
    %c0_36 = arith.constant 0 : index
    %c768 = arith.constant 768 : index
    %68 = vector.load %arg1[%c0_36, %c768] : memref<4x1024xf32, #tpu.memory_space<vmem>>, vector<4x256xf32>
    %cst_37 = arith.constant dense<0.000000e+00> : vector<32x256xf32>
    %69 = tpu.matmul %0, %68, %cst_37 {dimension_numbers = #tpu.dot_dimension_numbers<[1], [0], [0], [1], [0, 0, 1, 1], [], []>} : vector<32x4xf32>, vector<4x256xf32>, vector<32x256xf32> -> vector<32x256xf32>
    %70 = vector.broadcast %4 : vector<32x1xf32> to vector<32x256xf32>
    %71 = arith.addf %69, %70 : vector<32x256xf32>
    %72 = math.tanh %71 : vector<32x256xf32>
    %73 = arith.truncf %72 : vector<32x256xf32> to vector<32x256xbf16>
    %cst_38 = arith.constant dense<0.000000e+00> : vector<32x256xf32>
    %74 = tpu.matmul %1, %73, %cst_38 {dimension_numbers = #tpu.dot_dimension_numbers<[1], [0], [0], [1], [0, 0, 1, 1], [], []>} : vector<32x32xbf16>, vector<32x256xbf16>, vector<32x256xf32> -> vector<32x256xf32>
    %75 = vector.broadcast %5 : vector<32x1xf32> to vector<32x256xf32>
    %76 = arith.addf %74, %75 : vector<32x256xf32>
    %77 = math.tanh %76 : vector<32x256xf32>
    %78 = arith.truncf %77 : vector<32x256xf32> to vector<32x256xbf16>
    %cst_39 = arith.constant dense<0.000000e+00> : vector<32x256xf32>
    %79 = tpu.matmul %2, %78, %cst_39 {dimension_numbers = #tpu.dot_dimension_numbers<[1], [0], [0], [1], [0, 0, 1, 1], [], []>} : vector<32x32xbf16>, vector<32x256xbf16>, vector<32x256xf32> -> vector<32x256xf32>
    %80 = vector.broadcast %6 : vector<32x1xf32> to vector<32x256xf32>
    %81 = arith.addf %79, %80 : vector<32x256xf32>
    %82 = math.tanh %81 : vector<32x256xf32>
    %83 = arith.truncf %82 : vector<32x256xf32> to vector<32x256xbf16>
    %cst_40 = arith.constant dense<0.000000e+00> : vector<3x256xf32>
    %84 = tpu.matmul %3, %83, %cst_40 {dimension_numbers = #tpu.dot_dimension_numbers<[1], [0], [0], [1], [0, 0, 1, 1], [], []>} : vector<3x32xbf16>, vector<32x256xbf16>, vector<3x256xf32> -> vector<3x256xf32>
    %85 = vector.broadcast %7 : vector<3x1xf32> to vector<3x256xf32>
    %86 = arith.addf %84, %85 : vector<3x256xf32>
    %c0_41 = arith.constant 0 : index
    %c768_42 = arith.constant 768 : index
    %87 = vector.load %arg10[%c0_41, %c768_42] : memref<3x1024xf32, #tpu.memory_space<vmem>>, vector<3x256xf32>
    tpu.vector_store %arg10[%c0_41, %c768_42], %86 {strides = array<i32>} : memref<3x1024xf32, #tpu.memory_space<vmem>>, vector<3x256xf32>,
    return
  }
  func.func @transform_0(%arg0: i32) -> (i32, i32) {
    %c0_i32 = arith.constant 0 : i32
    %c0_i32_0 = arith.constant 0 : i32
    return %c0_i32, %arg0 : i32, i32
  }
  func.func @transform_1(%arg0: i32) -> (i32, i32) {
    %c0_i32 = arith.constant 0 : i32
    %c0_i32_0 = arith.constant 0 : i32
    %c0_i32_1 = arith.constant 0 : i32
    return %c0_i32, %c0_i32_0 : i32, i32
  }
  func.func @transform_2(%arg0: i32) -> (i32, i32) {
    %c0_i32 = arith.constant 0 : i32
    %c0_i32_0 = arith.constant 0 : i32
    %c0_i32_1 = arith.constant 0 : i32
    return %c0_i32, %c0_i32_0 : i32, i32
  }
  func.func @transform_3(%arg0: i32) -> (i32, i32) {
    %c0_i32 = arith.constant 0 : i32
    %c0_i32_0 = arith.constant 0 : i32
    %c0_i32_1 = arith.constant 0 : i32
    return %c0_i32, %c0_i32_0 : i32, i32
  }
  func.func @transform_4(%arg0: i32) -> (i32, i32) {
    %c0_i32 = arith.constant 0 : i32
    %c0_i32_0 = arith.constant 0 : i32
    %c0_i32_1 = arith.constant 0 : i32
    return %c0_i32, %c0_i32_0 : i32, i32
  }
  func.func @transform_5(%arg0: i32) -> (i32, i32) {
    %c0_i32 = arith.constant 0 : i32
    %c0_i32_0 = arith.constant 0 : i32
    %c0_i32_1 = arith.constant 0 : i32
    return %c0_i32, %c0_i32_0 : i32, i32
  }
  func.func @transform_6(%arg0: i32) -> (i32, i32) {
    %c0_i32 = arith.constant 0 : i32
    %c0_i32_0 = arith.constant 0 : i32
    %c0_i32_1 = arith.constant 0 : i32
    return %c0_i32, %c0_i32_0 : i32, i32
  }
  func.func @transform_7(%arg0: i32) -> (i32, i32) {
    %c0_i32 = arith.constant 0 : i32
    %c0_i32_0 = arith.constant 0 : i32
    %c0_i32_1 = arith.constant 0 : i32
    return %c0_i32, %c0_i32_0 : i32, i32
  }
  func.func @transform_8(%arg0: i32) -> (i32, i32) {
    %c0_i32 = arith.constant 0 : i32
    %c0_i32_0 = arith.constant 0 : i32
    %c0_i32_1 = arith.constant 0 : i32
    return %c0_i32, %c0_i32_0 : i32, i32
  }
  func.func @transform_9(%arg0: i32) -> (i32, i32) {
    %c0_i32 = arith.constant 0 : i32
    %c0_i32_0 = arith.constant 0 : i32
    return %c0_i32, %arg0 : i32, i32
  }
}

</mosaic_0001>

<bundles_post_ra>
// kernel: tpu_custom_call.1
= control target key start
LH: loop header
LB: loop body
LE: loop exit
PB: predicated region body
PF: predicated region fallthrough
CT: control target
= control target key end

     0   :  { %vm96_vm0 = vcmask 1043456   ;;  %v1602_v2 = vmov 0.0   ;;  %vm83_vm1 = vcmask 31744   ;;  %v1603_v5 = vmov 0   ;;  %s2011_s0 = inlined_call_operand.vmem [shape: f32[4,1024], index: 0, kind: input, shape index: {}]   ;;  %s2012_s1 = inlined_call_operand.vmem [shape: f32[32,4], index: 1, kind: input, shape index: {}]   ;;  %s2013_s2 = inlined_call_operand.vmem [shape: f32[32,1], index: 2, kind: input, shape index: {}]   ;;  %s2014_s3 = inlined_call_operand.vmem [shape: bf16[32,32], index: 3, kind: input, shape index: {}]   ;;  %s2015_s4 = inlined_call_operand.vmem [shape: f32[32,1], index: 4, kind: input, shape index: {}]   ;;  %s2016_s5 = inlined_call_operand.vmem [shape: bf16[32,32], index: 5, kind: input, shape index: {}]   ;;  %s2017_s6 = inlined_call_operand.vmem [shape: f32[32,1], index: 6, kind: input, shape index: {}]   ;;  %s2018_s7 = inlined_call_operand.vmem [shape: bf16[3,32], index: 7, kind: input, shape index: {}]   ;;  %s2019_s8 = inlined_call_operand.vmem [shape: f32[3,1], index: 8, kind: input, shape index: {}]   ;;  %s2020_s9 = inlined_call_operand.hbm [shape: f32[3,1024], index: 9, kind: output, shape index: {}]  }
   0x1   :  { %v60_v0 = vld [vmem:[%s2011_s0] sm:$0xff]  ;;  %165 = vmatprep.mubr.f32.mxu0 %v1602_v2  ;;  %1376 = vset.pattern.permute.xlu0 %v1603_v5  ;;  %v49_v6 = vld [vmem:[%s2013_s2 + $0x10] sm:$0xff]  ;;  %v48_v7 = vld [vmem:[%s2013_s2 + $0x8] sm:$0xff] }
   0x2   :  { %v82_v1 = vcombine.high %v60_v0, %v60_v0  ;;  %v47_v3 = vld [vmem:[%s2013_s2] sm:$0xff]  ;;  %1377 = vset.pattern.permute.xlu1 %v1603_v5  ;;  %v1682_v8 = vld [vmem:[%s2012_s1 + $0x8] sm:$0xff]  ;;  %v50_v9 = vld [vmem:[%s2013_s2 + $0x18] sm:$0xff]  ;;  %271 = vmatprep.mubr.bf16.mxu1 %v1603_v5 }
   0x3   :  { %v1665_v4 = vld [vmem:[%s2012_s1] sm:$0xff]  ;;  %63 = vperm.xlu0 %1376, %v47_v3   ;;  %73 = vperm.xlu1 %1377, %v49_v6  }
   0x4   :  { %1325 = vmatprep.subr.msk.mxu0 %vm96_vm0, %v82_v1  ;;  %v51_v10 = vld [vmem:[%s2015_s4] sm:$0xff] }
   0x5   :  { %1326 = vmatpush1.msk.msra.mxu0 %vm96_vm0, %v60_v0 }
   0x6   :  { %1327 = vmatmul.mubr.msk.f32.vlgmr.msra.gmra.mrb[0].mxu0 %vm83_vm1, %v1665_v4 }
   0x7   :  { %171 = vmatprep.mubr.f32.mxu0 %v1602_v2  ;;  %68 = vperm.xlu0 %1376, %v48_v7  }
   0x8   :  { %78 = vperm.xlu1 %1377, %v50_v9  }
   0x9   :  { %14 = vsyncpa [#allocation3], 0  ;;  %v52_v11 = vld [vmem:[%s2015_s4 + $0x8] sm:$0xff]  ;;  %v1701_v12 = vld [vmem:[%s2012_s1 + $0x10] sm:$0xff]  ;;  %vm232_vm2 = vcmask 261120  }
   0xa   :  { %1328 = vmatmul.mubr.msk.f32.gmra.mrb[2].mxu0 %vm83_vm1, %v1682_v8  ;;  %v53_v13 = vld [vmem:[%s2015_s4 + $0x10] sm:$0xff]  ;;  %v54_v14 = vld [vmem:[%s2015_s4 + $0x18] sm:$0xff]  ;;  %v55_v16 = vld [vmem:[%s2017_s6] sm:$0xff] }
   0xb   :  { %177 = vmatprep.mubr.f32.mxu0 %v1602_v2  ;;  %204 = vperm.xlu0 %1376, %v51_v10   ;;  %v1715_v15 = vld [vmem:[%s2012_s1 + $0x18] sm:$0xff]  ;;  %v56_v17 = vld [vmem:[%s2017_s6 + $0x8] sm:$0xff]  ;;  %v57_v18 = vld [vmem:[%s2017_s6 + $0x10] sm:$0xff] }
   0xc   :  { %209 = vperm.xlu1 %1377, %v52_v11   ;;  %v58_v19 = vld [vmem:[%s2017_s6 + $0x18] sm:$0xff]  ;;  %v59_v20 = vld [vmem:[%s2019_s8] sm:$0x7]  ;;  %v1762_v54 = vld [vmem:[%s2014_s3 + $0x8] sm:$0xff]  }
   0xd   :  { %v1754_v53 = vld [vmem:[%s2014_s3] sm:$0xff]  }
   0xe   :  { %1329 = vmatmul.mubr.msk.f32.gmra.mrb[4].mxu0 %vm83_vm1, %v1701_v12 }
   0xf   :  { %183 = vmatprep.mubr.f32.mxu0 %v1602_v2  ;;  %214 = vperm.xlu0 %1376, %v53_v13  }
  0x10   :  { %219 = vperm.xlu1 %1377, %v54_v14  }
  0x12   :  { %1330 = vmatmul.mubr.msk.f32.gmra.mrb[6].mxu0 %vm83_vm1, %v1715_v15 }
  0x13   :  { %372 = vmatprep.mubr.bf16.mxu0 %v1603_v5  ;;  %306 = vperm.xlu0 %1376, %v55_v16  }
  0x14   :  { %311 = vperm.xlu1 %1377, %v56_v17  }
  0x17   :  { %316 = vperm.xlu0 %1376, %v57_v18  }
  0x18   :  { %321 = vperm.xlu1 %1377, %v58_v19  }
  0x1b   :  { %407 = vperm.xlu0 %1376, %v59_v20  }
  0x82   :  { %v1735_v21 = vpop.permute.xlu0 %63  ;;  %v1742_v30 = vpop.permute.xlu1 %73 }
  0x86   :  { %v1739_v26 = vpop.permute.xlu0 %68 }
  0x87   :  { %v1747_v36 = vpop.permute.xlu1 %78 }
  0x8a   :  { %v1767_v55 = vpop.permute.xlu0 %204 }
  0x8b   :  { %v1770_v59 = vpop.permute.xlu1 %209 }
  0x8e   :  { %v1775_v1 = vpop.permute.xlu0 %214 }
  0x8f   :  { %v1778_v9 = vpop.permute.xlu1 %219 }
  0xd9   :  { %v167_v22 = vpop.f32.mrb[0].mxu0 }
  0xda   :  { %v168_v23 = vadd.f32 %v167_v22, %v1735_v21  ;;  %v169_v24 = vpop.f32.mrb[1].mxu0 }
  0xdb   :  { %v170_v25 = vadd.f32 %v169_v24, %v1735_v21 }
  0xdc   :  { %1386 = vtanh.f32 %v168_v23 }
  0xdd   :  { %v173_v27 = vpop.f32.mrb[2].mxu0  ;;  %1388 = vtanh.f32 %v170_v25 }
  0xde   :  { %v174_v28 = vadd.f32 %v173_v27, %v1739_v26  ;;  %v175_v29 = vpop.f32.mrb[3].mxu0 }
  0xdf   :  { %v176_v31 = vadd.f32 %v175_v29, %v1739_v26 }
  0xe0   :  { %1390 = vtanh.f32 %v174_v28 }
  0xe1   :  { %1392 = vtanh.f32 %v176_v31  ;;  %v179_v32 = vpop.f32.mrb[4].mxu0 }
  0xe2   :  { %v180_v33 = vadd.f32 %v179_v32, %v1742_v30  ;;  %v181_v34 = vpop.f32.mrb[5].mxu0  ;;  %v1786_v32 = vld [vmem:[%s2016_s5] sm:$0xff]  }
  0xe3   :  { %v182_v35 = vadd.f32 %v181_v34, %v1742_v30  ;;  %v1799_v34 = vpop.permute.xlu0 %306 }
  0xe4   :  { %1394 = vtanh.f32 %v180_v33  ;;  %v1794_v33 = vld [vmem:[%s2016_s5 + $0x8] sm:$0xff]  }
  0xe5   :  { %v185_v37 = vpop.f32.mrb[6].mxu0  ;;  %1396 = vtanh.f32 %v182_v35 }
  0xe6   :  { %v186_v38 = vadd.f32 %v185_v37, %v1747_v36  ;;  %v187_v39 = vpop.f32.mrb[7].mxu0  ;;  %v1387_v41 = vpop.eup %1386 }
  0xe7   :  { %v188_v40 = vadd.f32 %v187_v39, %v1747_v36  ;;  %v1389_v42 = vpop.eup %1388  ;;  %v1802_v39 = vpop.permute.xlu1 %311 }
  0xe8   :  { %1398 = vtanh.f32 %v186_v38 }
  0xe9   :  { %1400 = vtanh.f32 %v188_v40 }
  0xea   :  { %v1391_v43 = vpop.eup %1390 }
  0xeb   :  { %v1393_v44 = vpop.eup %1392  ;;  %v198_v45 = vpack.c.bf16 %v1391_v43, %v1387_v41 }
  0xec   :  { %v199_v46 = vpack.c.bf16 %v1393_v44, %v1389_v42 }
  0xee   :  { %239 = vmatprep.subr.bf16.mxu1 %v199_v46  ;;  %v1395_v47 = vpop.eup %1394 }
  0xef   :  { %240 = vmatpush1.bf16.msra.mxu1 %v198_v45  ;;  %v1397_v48 = vpop.eup %1396  ;;  %v1807_v45 = vpop.permute.xlu0 %316 }
  0xf2   :  { %v1399_v49 = vpop.eup %1398 }
  0xf3   :  { %v1401_v50 = vpop.eup %1400  ;;  %v200_v51 = vpack.c.bf16 %v1399_v49, %v1395_v47  ;;  %v1810_v49 = vpop.permute.xlu1 %321 }
  0xf4   :  { %v201_v52 = vpack.c.bf16 %v1401_v50, %v1397_v48 }
  0xf6   :  { %241 = vmatprep.subr.bf16.mxu1 %v201_v52 }
  0xf7   :  { %242 = vmatpush1.bf16.msra.mxu1 %v200_v51 }
  0xfa   :  { %1333 = vmatmul.mubr.msk.bf16.vlgmr.msra.gmra.mrb[0].mxu1 %vm232_vm2, %v1754_v53 }
  0xfb   :  { %281 = vmatprep.mubr.bf16.mxu1 %v1603_v5 }
 0x102   :  { %1334 = vmatmul.mubr.msk.bf16.gmra.mrb[4].mxu1 %vm232_vm2, %v1762_v54 }
 0x103   :  { %445 = vmatprep.mubr.bf16.mxu1 %v1603_v5 }
 0x1cd   :  { %v273_v56 = vpop.f32.mrb[0].mxu1 }
 0x1ce   :  { %v274_v57 = vadd.f32 %v273_v56, %v1767_v55  ;;  %v275_v58 = vpop.f32.mrb[1].mxu1 }
 0x1cf   :  { %v276_v60 = vadd.f32 %v275_v58, %v1767_v55  ;;  %v277_v61 = vpop.f32.mrb[2].mxu1 }
 0x1d0   :  { %1402 = vtanh.f32 %v274_v57  ;;  %v278_v62 = vadd.f32 %v277_v61, %v1770_v59  ;;  %v279_v63 = vpop.f32.mrb[3].mxu1 }
 0x1d1   :  { %1404 = vtanh.f32 %v276_v60  ;;  %v280_v0 = vadd.f32 %v279_v63, %v1770_v59 }
 0x1d2   :  { %1406 = vtanh.f32 %v278_v62 }
 0x1d3   :  { %1408 = vtanh.f32 %v280_v0 }
 0x1d5   :  { %v283_v3 = vpop.f32.mrb[4].mxu1 }
 0x1d6   :  { %v284_v6 = vadd.f32 %v283_v3, %v1775_v1  ;;  %v285_v7 = vpop.f32.mrb[5].mxu1 }
 0x1d7   :  { %v286_v10 = vadd.f32 %v285_v7, %v1775_v1  ;;  %v287_v11 = vpop.f32.mrb[6].mxu1  ;;  %v459_v7 = vld [vmem:[%s2011_s0 + $0x8] sm:$0xff] }
 0x1d8   :  { %1410 = vtanh.f32 %v284_v6  ;;  %v288_v13 = vadd.f32 %v287_v11, %v1778_v9  ;;  %v289_v14 = vpop.f32.mrb[7].mxu1 }
 0x1d9   :  { %1412 = vtanh.f32 %v286_v10  ;;  %v290_v16 = vadd.f32 %v289_v14, %v1778_v9 }
 0x1da   :  { %v1403_v17 = vpop.eup %1402  ;;  %1414 = vtanh.f32 %v288_v13 }
 0x1db   :  { %v1405_v18 = vpop.eup %1404  ;;  %1416 = vtanh.f32 %v290_v16  ;;  %v461_v16 = vcombine.high %v459_v7, %v459_v7 }
 0x1dc   :  { %v1407_v19 = vpop.eup %1406 }
 0x1dd   :  { %v1409_v20 = vpop.eup %1408  ;;  %v300_v22 = vpack.c.bf16 %v1407_v19, %v1403_v17  ;;  %v1821_v17 = vld [vmem:[%s2018_s7] sm:$0x3] }
 0x1de   :  { %v301_v23 = vpack.c.bf16 %v1409_v20, %v1405_v18  ;;  %v1840_v18 = vpop.permute.xlu0 %407 }
 0x1e0   :  { %340 = vmatprep.subr.bf16.mxu0 %v301_v23 }
 0x1e1   :  { %341 = vmatpush1.bf16.msra.mxu0 %v300_v22 }
 0x1e2   :  { %v1411_v24 = vpop.eup %1410 }
 0x1e3   :  { %v1413_v25 = vpop.eup %1412 }
 0x1e4   :  { %v1415_v27 = vpop.eup %1414 }
 0x1e5   :  { %v1417_v28 = vpop.eup %1416  ;;  %v302_v29 = vpack.c.bf16 %v1415_v27, %v1411_v24 }
 0x1e6   :  { %v303_v31 = vpack.c.bf16 %v1417_v28, %v1413_v25 }
 0x1e8   :  { %342 = vmatprep.subr.bf16.mxu0 %v303_v31 }
 0x1e9   :  { %343 = vmatpush1.bf16.msra.mxu0 %v302_v29 }
 0x1ec   :  { %1337 = vmatmul.mubr.msk.bf16.vlgmr.msra.gmra.mrb[8].mxu0 %vm232_vm2, %v1786_v32 }
 0x1ed   :  { %382 = vmatprep.mubr.bf16.mxu0 %v1603_v5 }
 0x1f4   :  { %1338 = vmatmul.mubr.msk.bf16.gmra.mrb[12].mxu0 %vm232_vm2, %v1794_v33 }
 0x1f5   :  { %599 = vmatprep.mubr.bf16.mxu0 %v1603_v5 }
 0x2bf   :  { %v374_v35 = vpop.f32.mrb[8].mxu0 }
 0x2c0   :  { %v375_v37 = vadd.f32 %v374_v35, %v1799_v34  ;;  %v376_v38 = vpop.f32.mrb[9].mxu0 }
 0x2c1   :  { %v377_v40 = vadd.f32 %v376_v38, %v1799_v34  ;;  %v378_v41 = vpop.f32.mrb[10].mxu0 }
 0x2c2   :  { %1418 = vtanh.f32 %v375_v37  ;;  %v379_v42 = vadd.f32 %v378_v41, %v1802_v39  ;;  %v380_v43 = vpop.f32.mrb[11].mxu0 }
 0x2c3   :  { %1420 = vtanh.f32 %v377_v40  ;;  %v381_v44 = vadd.f32 %v380_v43, %v1802_v39 }
 0x2c4   :  { %1422 = vtanh.f32 %v379_v42 }
 0x2c5   :  { %1424 = vtanh.f32 %v381_v44 }
 0x2c7   :  { %v384_v46 = vpop.f32.mrb[12].mxu0 }
 0x2c8   :  { %v385_v47 = vadd.f32 %v384_v46, %v1807_v45  ;;  %v386_v48 = vpop.f32.mrb[13].mxu0 }
 0x2c9   :  { %v387_v50 = vadd.f32 %v386_v48, %v1807_v45  ;;  %v388_v51 = vpop.f32.mrb[14].mxu0 }
 0x2ca   :  { %1426 = vtanh.f32 %v385_v47  ;;  %v389_v52 = vadd.f32 %v388_v51, %v1810_v49  ;;  %v390_v56 = vpop.f32.mrb[15].mxu0 }
 0x2cb   :  { %1428 = vtanh.f32 %v387_v50  ;;  %v391_v57 = vadd.f32 %v390_v56, %v1810_v49 }
 0x2cc   :  { %v1419_v58 = vpop.eup %1418  ;;  %1430 = vtanh.f32 %v389_v52 }
 0x2cd   :  { %v1421_v60 = vpop.eup %1420  ;;  %1432 = vtanh.f32 %v391_v57 }
 0x2ce   :  { %v1423_v61 = vpop.eup %1422 }
 0x2cf   :  { %v1425_v62 = vpop.eup %1424  ;;  %v401_v63 = vpack.c.bf16 %v1423_v61, %v1419_v58 }
 0x2d0   :  { %v402_v0 = vpack.c.bf16 %v1425_v62, %v1421_v60 }
 0x2d2   :  { %413 = vmatprep.subr.bf16.mxu1 %v402_v0 }
 0x2d3   :  { %414 = vmatpush1.bf16.msra.mxu1 %v401_v63 }
 0x2d4   :  { %v1427_v3 = vpop.eup %1426 }
 0x2d5   :  { %v1429_v6 = vpop.eup %1428 }
 0x2d6   :  { %v1431_v10 = vpop.eup %1430 }
 0x2d7   :  { %v1433_v11 = vpop.eup %1432  ;;  %v403_v13 = vpack.c.bf16 %v1431_v10, %v1427_v3 }
 0x2d8   :  { %v404_v14 = vpack.c.bf16 %v1433_v11, %v1429_v6 }
 0x2da   :  { %415 = vmatprep.subr.bf16.mxu1 %v404_v14 }
 0x2db   :  { %416 = vmatpush1.bf16.msra.mxu1 %v403_v13 }
 0x2dc   :  { %1340 = vmatprep.subr.msk.mxu1 %vm96_vm0, %v461_v16 }
 0x2de   :  { %1339 = vmatmul.mubr.msk.bf16.vlgmr.msra.gmra.mrb[8].mxu1 %vm232_vm2, %v1821_v17 }
 0x2df   :  { %1341 = vmatpush1.msk.msra.mxu1 %vm96_vm0, %v459_v7  ;;  %530 = vmatprep.mubr.f32.mxu1 %v1602_v2 }
 0x2e6   :  { %1342 = vmatmul.mubr.msk.f32.vlgmr.msra.gmra.mrb[12].mxu1 %vm83_vm1, %v1665_v4 }
 0x2e7   :  { %536 = vmatprep.mubr.f32.mxu1 %v1602_v2 }
 0x2ea   :  { %1343 = vmatmul.mubr.msk.f32.gmra.mrb[14].mxu1 %vm83_vm1, %v1682_v8 }
 0x2eb   :  { %542 = vmatprep.mubr.f32.mxu1 %v1602_v2 }
 0x2ee   :  { %1344 = vmatmul.mubr.msk.f32.gmra.mrb[16].mxu1 %vm83_vm1, %v1701_v12 }
 0x2ef   :  { %548 = vmatprep.mubr.f32.mxu1 %v1602_v2 }
 0x2f2   :  { %1345 = vmatmul.mubr.msk.f32.gmra.mrb[18].mxu1 %vm83_vm1, %v1715_v15 }
 0x2f3   :  { %664 = vmatprep.mubr.bf16.mxu1 %v1603_v5 }
 0x3b1   :  { %v447_v19 = vpop.f32.mrb[8].mxu1 }
 0x3b2   :  { %v448_v20 = vadd.f32 %v447_v19, %v1840_v18  ;;  %v449_v22 = vpop.f32.mrb[9].mxu1 }
 0x3b3   :  { %v450_v23 = vadd.f32 %v449_v22, %v1840_v18  ;;  %v451_v24 = vpop.f32.mrb[10].mxu1 }
 0x3b4   :  { %v452_v25 = vpop.f32.mrb[11].mxu1 }
 0x3b5   :  { %v456_v27 = vcombine.low %v448_v20, %v450_v23 }
 0x3b7   :  { %458 = vst [vmem:[#allocation2] sm:$0x77] %v456_v27 }
 0x3b9   :  { %v532_v28 = vpop.f32.mrb[12].mxu1 }
 0x3ba   :  { %v533_v29 = vadd.f32 %v532_v28, %v1735_v21  ;;  %v534_v31 = vpop.f32.mrb[13].mxu1 }
 0x3bb   :  { %v535_v35 = vadd.f32 %v534_v31, %v1735_v21 }
 0x3bc   :  { %1434 = vtanh.f32 %v533_v29 }
 0x3bd   :  { %v538_v37 = vpop.f32.mrb[14].mxu1  ;;  %1436 = vtanh.f32 %v535_v35 }
 0x3be   :  { %v539_v38 = vadd.f32 %v538_v37, %v1739_v26  ;;  %v540_v40 = vpop.f32.mrb[15].mxu1 }
 0x3bf   :  { %v541_v41 = vadd.f32 %v540_v40, %v1739_v26 }
 0x3c0   :  { %1438 = vtanh.f32 %v539_v38 }
 0x3c1   :  { %1440 = vtanh.f32 %v541_v41  ;;  %v544_v42 = vpop.f32.mrb[16].mxu1 }
 0x3c2   :  { %v545_v43 = vadd.f32 %v544_v42, %v1742_v30  ;;  %v546_v44 = vpop.f32.mrb[17].mxu1 }
 0x3c3   :  { %v547_v46 = vadd.f32 %v546_v44, %v1742_v30 }
 0x3c4   :  { %1442 = vtanh.f32 %v545_v43 }
 0x3c5   :  { %v550_v47 = vpop.f32.mrb[18].mxu1  ;;  %1444 = vtanh.f32 %v547_v46 }
 0x3c6   :  { %v551_v48 = vadd.f32 %v550_v47, %v1747_v36  ;;  %v552_v50 = vpop.f32.mrb[19].mxu1  ;;  %v1435_v52 = vpop.eup %1434 }
 0x3c7   :  { %v553_v51 = vadd.f32 %v552_v50, %v1747_v36  ;;  %v1437_v56 = vpop.eup %1436 }
 0x3c8   :  { %1446 = vtanh.f32 %v551_v48 }
 0x3c9   :  { %1448 = vtanh.f32 %v553_v51 }
 0x3ca   :  { %v1439_v57 = vpop.eup %1438 }
 0x3cb   :  { %v1441_v58 = vpop.eup %1440  ;;  %v563_v60 = vpack.c.bf16 %v1439_v57, %v1435_v52 }
 0x3cc   :  { %v564_v61 = vpack.c.bf16 %v1441_v58, %v1437_v56 }
 0x3ce   :  { %567 = vmatprep.subr.bf16.mxu0 %v564_v61  ;;  %v1443_v62 = vpop.eup %1442 }
 0x3cf   :  { %568 = vmatpush1.bf16.msra.mxu0 %v563_v60  ;;  %v1445_v63 = vpop.eup %1444 }
 0x3d2   :  { %v1447_v0 = vpop.eup %1446 }
 0x3d3   :  { %v1449_v3 = vpop.eup %1448  ;;  %v565_v6 = vpack.c.bf16 %v1447_v0, %v1443_v62 }
 0x3d4   :  { %v566_v7 = vpack.c.bf16 %v1449_v3, %v1445_v63 }
 0x3d6   :  { %569 = vmatprep.subr.bf16.mxu0 %v566_v7 }
 0x3d7   :  { %570 = vmatpush1.bf16.msra.mxu0 %v565_v6 }
 0x3da   :  { %1346 = vmatmul.mubr.msk.bf16.vlgmr.msra.gmra.mrb[16].mxu0 %vm232_vm2, %v1754_v53 }
 0x3db   :  { %609 = vmatprep.mubr.bf16.mxu0 %v1603_v5 }
 0x3e2   :  { %1347 = vmatmul.mubr.msk.bf16.gmra.mrb[20].mxu0 %vm232_vm2, %v1762_v54 }
 0x3e3   :  { %729 = vmatprep.mubr.bf16.mxu0 %v1603_v5 }
 0x4ad   :  { %v601_v10 = vpop.f32.mrb[16].mxu0 }
 0x4ae   :  { %v602_v11 = vadd.f32 %v601_v10, %v1767_v55  ;;  %v603_v13 = vpop.f32.mrb[17].mxu0 }
 0x4af   :  { %v604_v14 = vadd.f32 %v603_v13, %v1767_v55  ;;  %v605_v16 = vpop.f32.mrb[18].mxu0 }
 0x4b0   :  { %1450 = vtanh.f32 %v602_v11  ;;  %v606_v19 = vadd.f32 %v605_v16, %v1770_v59  ;;  %v607_v20 = vpop.f32.mrb[19].mxu0 }
 0x4b1   :  { %1452 = vtanh.f32 %v604_v14  ;;  %v608_v22 = vadd.f32 %v607_v20, %v1770_v59 }
 0x4b2   :  { %1454 = vtanh.f32 %v606_v19 }
 0x4b3   :  { %1456 = vtanh.f32 %v608_v22 }
 0x4b5   :  { %v611_v23 = vpop.f32.mrb[20].mxu0 }
 0x4b6   :  { %v612_v24 = vadd.f32 %v611_v23, %v1775_v1  ;;  %v613_v25 = vpop.f32.mrb[21].mxu0 }
 0x4b7   :  { %v614_v27 = vadd.f32 %v613_v25, %v1775_v1  ;;  %v615_v28 = vpop.f32.mrb[22].mxu0 }
 0x4b8   :  { %1458 = vtanh.f32 %v612_v24  ;;  %v616_v29 = vadd.f32 %v615_v28, %v1778_v9  ;;  %v617_v31 = vpop.f32.mrb[23].mxu0  ;;  %v743_v28 = vld [vmem:[%s2011_s0 + $0x10] sm:$0xff] }
 0x4b9   :  { %1460 = vtanh.f32 %v614_v27  ;;  %v618_v35 = vadd.f32 %v617_v31, %v1778_v9 }
 0x4ba   :  { %v1451_v37 = vpop.eup %1450  ;;  %1462 = vtanh.f32 %v616_v29 }
 0x4bb   :  { %v1453_v38 = vpop.eup %1452  ;;  %1464 = vtanh.f32 %v618_v35 }
 0x4bc   :  { %v1455_v40 = vpop.eup %1454 }
 0x4bd   :  { %v1457_v41 = vpop.eup %1456  ;;  %v628_v42 = vpack.c.bf16 %v1455_v40, %v1451_v37 }
 0x4be   :  { %v629_v43 = vpack.c.bf16 %v1457_v41, %v1453_v38  ;;  %v745_v38 = vcombine.high %v743_v28, %v743_v28 }
 0x4c0   :  { %632 = vmatprep.subr.bf16.mxu1 %v629_v43 }
 0x4c1   :  { %633 = vmatpush1.bf16.msra.mxu1 %v628_v42 }
 0x4c2   :  { %v1459_v44 = vpop.eup %1458 }
 0x4c3   :  { %v1461_v46 = vpop.eup %1460 }
 0x4c4   :  { %v1463_v47 = vpop.eup %1462 }
 0x4c5   :  { %v1465_v48 = vpop.eup %1464  ;;  %v630_v50 = vpack.c.bf16 %v1463_v47, %v1459_v44 }
 0x4c6   :  { %v631_v51 = vpack.c.bf16 %v1465_v48, %v1461_v46 }
 0x4c8   :  { %634 = vmatprep.subr.bf16.mxu1 %v631_v51 }
 0x4c9   :  { %635 = vmatpush1.bf16.msra.mxu1 %v630_v50 }
 0x4cc   :  { %1348 = vmatmul.mubr.msk.bf16.vlgmr.msra.gmra.mrb[20].mxu1 %vm232_vm2, %v1786_v32 }
 0x4cd   :  { %674 = vmatprep.mubr.bf16.mxu1 %v1603_v5 }
 0x4d4   :  { %1349 = vmatmul.mubr.msk.bf16.gmra.mrb[24].mxu1 %vm232_vm2, %v1794_v33 }
 0x4d5   :  { %883 = vmatprep.mubr.bf16.mxu1 %v1603_v5 }
 0x59f   :  { %v666_v52 = vpop.f32.mrb[20].mxu1 }
 0x5a0   :  { %v667_v56 = vadd.f32 %v666_v52, %v1799_v34  ;;  %v668_v57 = vpop.f32.mrb[21].mxu1 }
 0x5a1   :  { %v669_v58 = vadd.f32 %v668_v57, %v1799_v34  ;;  %v670_v60 = vpop.f32.mrb[22].mxu1 }
 0x5a2   :  { %1466 = vtanh.f32 %v667_v56  ;;  %v671_v61 = vadd.f32 %v670_v60, %v1802_v39  ;;  %v672_v62 = vpop.f32.mrb[23].mxu1 }
 0x5a3   :  { %1468 = vtanh.f32 %v669_v58  ;;  %v673_v63 = vadd.f32 %v672_v62, %v1802_v39 }
 0x5a4   :  { %1470 = vtanh.f32 %v671_v61 }
 0x5a5   :  { %1472 = vtanh.f32 %v673_v63 }
 0x5a7   :  { %v676_v0 = vpop.f32.mrb[24].mxu1 }
 0x5a8   :  { %v677_v3 = vadd.f32 %v676_v0, %v1807_v45  ;;  %v678_v6 = vpop.f32.mrb[25].mxu1 }
 0x5a9   :  { %v679_v7 = vadd.f32 %v678_v6, %v1807_v45  ;;  %v680_v10 = vpop.f32.mrb[26].mxu1 }
 0x5aa   :  { %1474 = vtanh.f32 %v677_v3  ;;  %v681_v11 = vadd.f32 %v680_v10, %v1810_v49  ;;  %v682_v13 = vpop.f32.mrb[27].mxu1 }
 0x5ab   :  { %1476 = vtanh.f32 %v679_v7  ;;  %v683_v14 = vadd.f32 %v682_v13, %v1810_v49 }
 0x5ac   :  { %v1467_v16 = vpop.eup %1466  ;;  %1478 = vtanh.f32 %v681_v11 }
 0x5ad   :  { %v1469_v19 = vpop.eup %1468  ;;  %1480 = vtanh.f32 %v683_v14 }
 0x5ae   :  { %v1471_v20 = vpop.eup %1470 }
 0x5af   :  { %v1473_v22 = vpop.eup %1472  ;;  %v693_v23 = vpack.c.bf16 %v1471_v20, %v1467_v16 }
 0x5b0   :  { %v694_v24 = vpack.c.bf16 %v1473_v22, %v1469_v19 }
 0x5b2   :  { %697 = vmatprep.subr.bf16.mxu0 %v694_v24 }
 0x5b3   :  { %698 = vmatpush1.bf16.msra.mxu0 %v693_v23 }
 0x5b4   :  { %v1475_v25 = vpop.eup %1474 }
 0x5b5   :  { %v1477_v27 = vpop.eup %1476 }
 0x5b6   :  { %v1479_v29 = vpop.eup %1478 }
 0x5b7   :  { %v1481_v31 = vpop.eup %1480  ;;  %v695_v35 = vpack.c.bf16 %v1479_v29, %v1475_v25 }
 0x5b8   :  { %v696_v37 = vpack.c.bf16 %v1481_v31, %v1477_v27 }
 0x5ba   :  { %699 = vmatprep.subr.bf16.mxu0 %v696_v37 }
 0x5bb   :  { %700 = vmatpush1.bf16.msra.mxu0 %v695_v35 }
 0x5bc   :  { %1351 = vmatprep.subr.msk.mxu0 %vm96_vm0, %v745_v38 }
 0x5be   :  { %1350 = vmatmul.mubr.msk.bf16.vlgmr.msra.gmra.mrb[24].mxu0 %vm232_vm2, %v1821_v17 }
 0x5bf   :  { %1352 = vmatpush1.msk.msra.mxu0 %vm96_vm0, %v743_v28  ;;  %814 = vmatprep.mubr.f32.mxu0 %v1602_v2 }
 0x5c6   :  { %1353 = vmatmul.mubr.msk.f32.vlgmr.msra.gmra.mrb[28].mxu0 %vm83_vm1, %v1665_v4 }
 0x5c7   :  { %820 = vmatprep.mubr.f32.mxu0 %v1602_v2 }
 0x5ca   :  { %1354 = vmatmul.mubr.msk.f32.gmra.mrb[30].mxu0 %vm83_vm1, %v1682_v8 }
 0x5cb   :  { %826 = vmatprep.mubr.f32.mxu0 %v1602_v2 }
 0x5ce   :  { %1355 = vmatmul.mubr.msk.f32.gmra.mrb[32].mxu0 %vm83_vm1, %v1701_v12 }
 0x5cf   :  { %832 = vmatprep.mubr.f32.mxu0 %v1602_v2 }
 0x5d2   :  { %1356 = vmatmul.mubr.msk.f32.gmra.mrb[34].mxu0 %vm83_vm1, %v1715_v15 }
 0x5d3   :  { %948 = vmatprep.mubr.bf16.mxu0 %v1603_v5 }
 0x691   :  { %v731_v40 = vpop.f32.mrb[24].mxu0 }
 0x692   :  { %v732_v41 = vadd.f32 %v731_v40, %v1840_v18  ;;  %v733_v42 = vpop.f32.mrb[25].mxu0 }
 0x693   :  { %v734_v43 = vadd.f32 %v733_v42, %v1840_v18  ;;  %v735_v44 = vpop.f32.mrb[26].mxu0 }
 0x694   :  { %v736_v46 = vpop.f32.mrb[27].mxu0 }
 0x695   :  { %v740_v47 = vcombine.low %v732_v41, %v734_v43 }
 0x697   :  { %742 = vst [vmem:[#allocation2 + $0x8] sm:$0x77] %v740_v47 }
 0x699   :  { %v816_v48 = vpop.f32.mrb[28].mxu0 }
 0x69a   :  { %v817_v50 = vadd.f32 %v816_v48, %v1735_v21  ;;  %v818_v51 = vpop.f32.mrb[29].mxu0 }
 0x69b   :  { %v819_v52 = vadd.f32 %v818_v51, %v1735_v21 }
 0x69c   :  { %1482 = vtanh.f32 %v817_v50 }
 0x69d   :  { %v822_v56 = vpop.f32.mrb[30].mxu0  ;;  %1484 = vtanh.f32 %v819_v52 }
 0x69e   :  { %v823_v57 = vadd.f32 %v822_v56, %v1739_v26  ;;  %v824_v58 = vpop.f32.mrb[31].mxu0 }
 0x69f   :  { %v825_v60 = vadd.f32 %v824_v58, %v1739_v26 }
 0x6a0   :  { %1486 = vtanh.f32 %v823_v57 }
 0x6a1   :  { %1488 = vtanh.f32 %v825_v60  ;;  %v828_v61 = vpop.f32.mrb[32].mxu0 }
 0x6a2   :  { %v829_v62 = vadd.f32 %v828_v61, %v1742_v30  ;;  %v830_v63 = vpop.f32.mrb[33].mxu0 }
 0x6a3   :  { %v831_v0 = vadd.f32 %v830_v63, %v1742_v30 }
 0x6a4   :  { %1490 = vtanh.f32 %v829_v62 }
 0x6a5   :  { %v834_v3 = vpop.f32.mrb[34].mxu0  ;;  %1492 = vtanh.f32 %v831_v0 }
 0x6a6   :  { %v835_v6 = vadd.f32 %v834_v3, %v1747_v36  ;;  %v836_v7 = vpop.f32.mrb[35].mxu0  ;;  %v1483_v11 = vpop.eup %1482 }
 0x6a7   :  { %v837_v10 = vadd.f32 %v836_v7, %v1747_v36  ;;  %v1485_v13 = vpop.eup %1484 }
 0x6a8   :  { %1494 = vtanh.f32 %v835_v6 }
 0x6a9   :  { %1496 = vtanh.f32 %v837_v10 }
 0x6aa   :  { %v1487_v14 = vpop.eup %1486 }
 0x6ab   :  { %v1489_v16 = vpop.eup %1488  ;;  %v847_v19 = vpack.c.bf16 %v1487_v14, %v1483_v11 }
 0x6ac   :  { %v848_v20 = vpack.c.bf16 %v1489_v16, %v1485_v13 }
 0x6ae   :  { %851 = vmatprep.subr.bf16.mxu1 %v848_v20  ;;  %v1491_v22 = vpop.eup %1490 }
 0x6af   :  { %852 = vmatpush1.bf16.msra.mxu1 %v847_v19  ;;  %v1493_v23 = vpop.eup %1492 }
 0x6b2   :  { %v1495_v24 = vpop.eup %1494 }
 0x6b3   :  { %v1497_v25 = vpop.eup %1496  ;;  %v849_v27 = vpack.c.bf16 %v1495_v24, %v1491_v22 }
 0x6b4   :  { %v850_v28 = vpack.c.bf16 %v1497_v25, %v1493_v23 }
 0x6b6   :  { %853 = vmatprep.subr.bf16.mxu1 %v850_v28 }
 0x6b7   :  { %854 = vmatpush1.bf16.msra.mxu1 %v849_v27 }
 0x6ba   :  { %1357 = vmatmul.mubr.msk.bf16.vlgmr.msra.gmra.mrb[28].mxu1 %vm232_vm2, %v1754_v53 }
 0x6bb   :  { %893 = vmatprep.mubr.bf16.mxu1 %v1603_v5 }
 0x6c2   :  { %1358 = vmatmul.mubr.msk.bf16.gmra.mrb[32].mxu1 %vm232_vm2, %v1762_v54 }
 0x6c3   :  { %1013 = vmatprep.mubr.bf16.mxu1 %v1603_v5 }
 0x78d   :  { %v885_v29 = vpop.f32.mrb[28].mxu1 }
 0x78e   :  { %v886_v31 = vadd.f32 %v885_v29, %v1767_v55  ;;  %v887_v35 = vpop.f32.mrb[29].mxu1 }
 0x78f   :  { %v888_v37 = vadd.f32 %v887_v35, %v1767_v55  ;;  %v889_v38 = vpop.f32.mrb[30].mxu1 }
 0x790   :  { %1498 = vtanh.f32 %v886_v31  ;;  %v890_v40 = vadd.f32 %v889_v38, %v1770_v59  ;;  %v891_v41 = vpop.f32.mrb[31].mxu1 }
 0x791   :  { %1500 = vtanh.f32 %v888_v37  ;;  %v892_v42 = vadd.f32 %v891_v41, %v1770_v59 }
 0x792   :  { %1502 = vtanh.f32 %v890_v40 }
 0x793   :  { %1504 = vtanh.f32 %v892_v42 }
 0x795   :  { %v895_v43 = vpop.f32.mrb[32].mxu1 }
 0x796   :  { %v896_v44 = vadd.f32 %v895_v43, %v1775_v1  ;;  %v897_v46 = vpop.f32.mrb[33].mxu1 }
 0x797   :  { %v898_v47 = vadd.f32 %v897_v46, %v1775_v1  ;;  %v899_v48 = vpop.f32.mrb[34].mxu1 }
 0x798   :  { %1506 = vtanh.f32 %v896_v44  ;;  %v900_v50 = vadd.f32 %v899_v48, %v1778_v9  ;;  %v901_v51 = vpop.f32.mrb[35].mxu1  ;;  %v1027_v48 = vld [vmem:[%s2011_s0 + $0x18] sm:$0xff]  ;;  %s1604_s0 = smov [#allocation2]  }
 0x799   :  { %1508 = vtanh.f32 %v898_v47  ;;  %v902_v52 = vadd.f32 %v901_v51, %v1778_v9  ;;  %s1317_s10 = sshll.u32 %s1604_s0, 4  ;;  %s1318_s10 = int_to_ptr.vmem [resolvable:$true] %s1317_s10 }
 0x79a   :  { %v1499_v56 = vpop.eup %1498  ;;  %1510 = vtanh.f32 %v900_v50  ;;  %s1578_s11 = scalar_lea.vmem %s1318_s10, 512  ;;  %p1583_p1 = scmp.lt.s32.totalorder %s1318_s10, %s1318_s10 }
 0x79b   :  { %v1501_v57 = vpop.eup %1500  ;;  %1512 = vtanh.f32 %v902_v52  ;;  %p1579_p0 = scmp.ne.s32.totalorder %s1318_s10, %s1578_s11  ;;  %p1584_p2 = scmp.lt.s32.totalorder %s1578_s11, %s1578_s11 }
 0x79c   :  { %v1503_v58 = vpop.eup %1502 }
 0x79d   :  { %v1505_v60 = vpop.eup %1504  ;;  %v912_v61 = vpack.c.bf16 %v1503_v58, %v1499_v56  ;;  %p1585_p3 = por %p1584_p2, %p1583_p1 }
 0x79e   :  { %v913_v62 = vpack.c.bf16 %v1505_v60, %v1501_v57  ;;  %v1029_v57 = vcombine.high %v1027_v48, %v1027_v48 }
 0x79f   :  { %p1586_p4 = pnand %p1585_p3, %p1579_p0 }
 0x7a0   :  { %916 = vmatprep.subr.bf16.mxu0 %v913_v62 }
 0x7a1   :  { %917 = vmatpush1.bf16.msra.mxu0 %v912_v61 }
 0x7a2   :  { %v1507_v63 = vpop.eup %1506 }
 0x7a3   :  { %v1509_v0 = vpop.eup %1508 }
 0x7a4   :  { %v1511_v3 = vpop.eup %1510 }
 0x7a5   :  { %v1513_v6 = vpop.eup %1512  ;;  %v914_v7 = vpack.c.bf16 %v1511_v3, %v1507_v63 }
 0x7a6   :  { %v915_v10 = vpack.c.bf16 %v1513_v6, %v1509_v0 }
 0x7a8   :  { %918 = vmatprep.subr.bf16.mxu0 %v915_v10 }
 0x7a9   :  { %919 = vmatpush1.bf16.msra.mxu0 %v914_v7 }
 0x7ac   :  { %1359 = vmatmul.mubr.msk.bf16.vlgmr.msra.gmra.mrb[36].mxu0 %vm232_vm2, %v1786_v32 }
 0x7ad   :  { %958 = vmatprep.mubr.bf16.mxu0 %v1603_v5 }
 0x7b4   :  { %1360 = vmatmul.mubr.msk.bf16.gmra.mrb[40].mxu0 %vm232_vm2, %v1794_v33 }
 0x7b5   :  { %1167 = vmatprep.mubr.bf16.mxu0 %v1603_v5 }
 0x87f   :  { %v950_v11 = vpop.f32.mrb[36].mxu0 }
 0x880   :  { %v951_v13 = vadd.f32 %v950_v11, %v1799_v34  ;;  %v952_v14 = vpop.f32.mrb[37].mxu0 }
 0x881   :  { %v953_v16 = vadd.f32 %v952_v14, %v1799_v34  ;;  %v954_v19 = vpop.f32.mrb[38].mxu0 }
 0x882   :  { %1514 = vtanh.f32 %v951_v13  ;;  %v955_v20 = vadd.f32 %v954_v19, %v1802_v39  ;;  %v956_v22 = vpop.f32.mrb[39].mxu0 }
 0x883   :  { %1516 = vtanh.f32 %v953_v16  ;;  %v957_v23 = vadd.f32 %v956_v22, %v1802_v39 }
 0x884   :  { %1518 = vtanh.f32 %v955_v20 }
 0x885   :  { %1520 = vtanh.f32 %v957_v23 }
 0x887   :  { %v960_v24 = vpop.f32.mrb[40].mxu0 }
 0x888   :  { %v961_v25 = vadd.f32 %v960_v24, %v1807_v45  ;;  %v962_v27 = vpop.f32.mrb[41].mxu0 }
 0x889   :  { %v963_v28 = vadd.f32 %v962_v27, %v1807_v45  ;;  %v964_v29 = vpop.f32.mrb[42].mxu0 }
 0x88a   :  { %1522 = vtanh.f32 %v961_v25  ;;  %v965_v31 = vadd.f32 %v964_v29, %v1810_v49  ;;  %v966_v35 = vpop.f32.mrb[43].mxu0 }
 0x88b   :  { %1524 = vtanh.f32 %v963_v28  ;;  %v967_v37 = vadd.f32 %v966_v35, %v1810_v49 }
 0x88c   :  { %v1515_v38 = vpop.eup %1514  ;;  %1526 = vtanh.f32 %v965_v31 }
 0x88d   :  { %v1517_v40 = vpop.eup %1516  ;;  %1528 = vtanh.f32 %v967_v37 }
 0x88e   :  { %v1519_v41 = vpop.eup %1518 }
 0x88f   :  { %v1521_v42 = vpop.eup %1520  ;;  %v977_v43 = vpack.c.bf16 %v1519_v41, %v1515_v38 }
 0x890   :  { %v978_v44 = vpack.c.bf16 %v1521_v42, %v1517_v40 }
 0x892   :  { %981 = vmatprep.subr.bf16.mxu1 %v978_v44 }
 0x893   :  { %982 = vmatpush1.bf16.msra.mxu1 %v977_v43 }
 0x894   :  { %v1523_v46 = vpop.eup %1522 }
 0x895   :  { %v1525_v47 = vpop.eup %1524 }
 0x896   :  { %v1527_v50 = vpop.eup %1526 }
 0x897   :  { %v1529_v51 = vpop.eup %1528  ;;  %v979_v52 = vpack.c.bf16 %v1527_v50, %v1523_v46 }
 0x898   :  { %v980_v56 = vpack.c.bf16 %v1529_v51, %v1525_v47 }
 0x89a   :  { %983 = vmatprep.subr.bf16.mxu1 %v980_v56 }
 0x89b   :  { %984 = vmatpush1.bf16.msra.mxu1 %v979_v52 }
 0x89c   :  { %1362 = vmatprep.subr.msk.mxu1 %vm96_vm0, %v1029_v57 }
 0x89e   :  { %1361 = vmatmul.mubr.msk.bf16.vlgmr.msra.gmra.mrb[36].mxu1 %vm232_vm2, %v1821_v17 }
 0x89f   :  { %1363 = vmatpush1.msk.msra.mxu1 %vm96_vm0, %v1027_v48  ;;  %1098 = vmatprep.mubr.f32.mxu1 %v1602_v2 }
 0x8a6   :  { %1364 = vmatmul.mubr.msk.f32.vlgmr.msra.gmra.mrb[40].mxu1 %vm83_vm1, %v1665_v4 }
 0x8a7   :  { %1104 = vmatprep.mubr.f32.mxu1 %v1602_v2 }
 0x8aa   :  { %1365 = vmatmul.mubr.msk.f32.gmra.mrb[42].mxu1 %vm83_vm1, %v1682_v8 }
 0x8ab   :  { %1110 = vmatprep.mubr.f32.mxu1 %v1602_v2 }
 0x8ae   :  { %1366 = vmatmul.mubr.msk.f32.gmra.mrb[44].mxu1 %vm83_vm1, %v1701_v12 }
 0x8af   :  { %1116 = vmatprep.mubr.f32.mxu1 %v1602_v2 }
 0x8b2   :  { %1367 = vmatmul.mubr.msk.f32.gmra.mrb[46].mxu1 %vm83_vm1, %v1715_v15 }
 0x8b3   :  { %1232 = vmatprep.mubr.bf16.mxu1 %v1603_v5 }
 0x971   :  { %v1015_v58 = vpop.f32.mrb[36].mxu1 }
 0x972   :  { %v1016_v4 = vadd.f32 %v1015_v58, %v1840_v18  ;;  %v1017_v60 = vpop.f32.mrb[37].mxu1 }
 0x973   :  { %v1018_v61 = vadd.f32 %v1017_v60, %v1840_v18  ;;  %v1019_v62 = vpop.f32.mrb[38].mxu1 }
 0x974   :  { %v1020_v8 = vpop.f32.mrb[39].mxu1 }
 0x975   :  { %v1024_v63 = vcombine.low %v1016_v4, %v1018_v61 }
 0x977   :  { %1026 = vst [vmem:[#allocation2 + $0x10] sm:$0x77] %v1024_v63 }
 0x979   :  { %v1100_v0 = vpop.f32.mrb[40].mxu1 }
 0x97a   :  { %v1101_v12 = vadd.f32 %v1100_v0, %v1735_v21  ;;  %v1102_v3 = vpop.f32.mrb[41].mxu1 }
 0x97b   :  { %v1103_v2 = vadd.f32 %v1102_v3, %v1735_v21 }
 0x97c   :  { %1530 = vtanh.f32 %v1101_v12 }
 0x97d   :  { %v1106_v6 = vpop.f32.mrb[42].mxu1  ;;  %1532 = vtanh.f32 %v1103_v2 }
 0x97e   :  { %v1107_v15 = vadd.f32 %v1106_v6, %v1739_v26  ;;  %v1108_v7 = vpop.f32.mrb[43].mxu1 }
 0x97f   :  { %v1109_v10 = vadd.f32 %v1108_v7, %v1739_v26 }
 0x980   :  { %1534 = vtanh.f32 %v1107_v15 }
 0x981   :  { %1536 = vtanh.f32 %v1109_v10  ;;  %v1112_v11 = vpop.f32.mrb[44].mxu1 }
 0x982   :  { %v1113_v13 = vadd.f32 %v1112_v11, %v1742_v30  ;;  %v1114_v14 = vpop.f32.mrb[45].mxu1 }
 0x983   :  { %v1115_v16 = vadd.f32 %v1114_v14, %v1742_v30 }
 0x984   :  { %1538 = vtanh.f32 %v1113_v13 }
 0x985   :  { %v1118_v19 = vpop.f32.mrb[46].mxu1  ;;  %1540 = vtanh.f32 %v1115_v16 }
 0x986   :  { %v1119_v21 = vadd.f32 %v1118_v19, %v1747_v36  ;;  %v1120_v20 = vpop.f32.mrb[47].mxu1  ;;  %v1531_v23 = vpop.eup %1530 }
 0x987   :  { %v1121_v22 = vadd.f32 %v1120_v20, %v1747_v36  ;;  %v1533_v24 = vpop.eup %1532 }
 0x988   :  { %1542 = vtanh.f32 %v1119_v21 }
 0x989   :  { %1544 = vtanh.f32 %v1121_v22 }
 0x98a   :  { %v1535_v26 = vpop.eup %1534 }
 0x98b   :  { %v1537_v25 = vpop.eup %1536  ;;  %v1131_v27 = vpack.c.bf16 %v1535_v26, %v1531_v23 }
 0x98c   :  { %v1132_v28 = vpack.c.bf16 %v1537_v25, %v1533_v24 }
 0x98e   :  { %1135 = vmatprep.subr.bf16.mxu0 %v1132_v28  ;;  %v1539_v29 = vpop.eup %1538 }
 0x98f   :  { %1136 = vmatpush1.bf16.msra.mxu0 %v1131_v27  ;;  %v1541_v30 = vpop.eup %1540 }
 0x992   :  { %v1543_v31 = vpop.eup %1542 }
 0x993   :  { %v1545_v35 = vpop.eup %1544  ;;  %v1133_v37 = vpack.c.bf16 %v1543_v31, %v1539_v29 }
 0x994   :  { %v1134_v38 = vpack.c.bf16 %v1545_v35, %v1541_v30 }
 0x996   :  { %1137 = vmatprep.subr.bf16.mxu0 %v1134_v38 }
 0x997   :  { %1138 = vmatpush1.bf16.msra.mxu0 %v1133_v37 }
 0x99a   :  { %1368 = vmatmul.mubr.msk.bf16.vlgmr.msra.gmra.mrb[44].mxu0 %vm232_vm2, %v1754_v53 }
 0x99b   :  { %1177 = vmatprep.mubr.bf16.mxu0 %v1603_v5 }
 0x9a2   :  { %1369 = vmatmul.mubr.msk.bf16.gmra.mrb[48].mxu0 %vm232_vm2, %v1762_v54 }
 0x9a3   :  { %1297 = vmatprep.mubr.bf16.mxu0 %v1603_v5 }
 0xa6d   :  { %v1169_v36 = vpop.f32.mrb[44].mxu0 }
 0xa6e   :  { %v1170_v40 = vadd.f32 %v1169_v36, %v1767_v55  ;;  %v1171_v41 = vpop.f32.mrb[45].mxu0 }
 0xa6f   :  { %v1172_v42 = vadd.f32 %v1171_v41, %v1767_v55  ;;  %v1173_v43 = vpop.f32.mrb[46].mxu0 }
 0xa70   :  { %1546 = vtanh.f32 %v1170_v40  ;;  %v1174_v44 = vadd.f32 %v1173_v43, %v1770_v59  ;;  %v1175_v46 = vpop.f32.mrb[47].mxu0 }
 0xa71   :  { %1548 = vtanh.f32 %v1172_v42  ;;  %v1176_v53 = vadd.f32 %v1175_v46, %v1770_v59 }
 0xa72   :  { %1550 = vtanh.f32 %v1174_v44 }
 0xa73   :  { %1552 = vtanh.f32 %v1176_v53 }
 0xa75   :  { %v1179_v47 = vpop.f32.mrb[48].mxu0 }
 0xa76   :  { %v1180_v54 = vadd.f32 %v1179_v47, %v1775_v1  ;;  %v1181_v48 = vpop.f32.mrb[49].mxu0 }
 0xa77   :  { %v1182_v50 = vadd.f32 %v1181_v48, %v1775_v1  ;;  %v1183_v51 = vpop.f32.mrb[50].mxu0 }
 0xa78   :  { %1554 = vtanh.f32 %v1180_v54  ;;  %v1184_v55 = vadd.f32 %v1183_v51, %v1778_v9  ;;  %v1185_v52 = vpop.f32.mrb[51].mxu0 }
 0xa79   :  { %1556 = vtanh.f32 %v1182_v50  ;;  %v1186_v56 = vadd.f32 %v1185_v52, %v1778_v9 }
 0xa7a   :  { %v1547_v57 = vpop.eup %1546  ;;  %1558 = vtanh.f32 %v1184_v55 }
 0xa7b   :  { %v1549_v58 = vpop.eup %1548  ;;  %1560 = vtanh.f32 %v1186_v56 }
 0xa7c   :  { %v1551_v59 = vpop.eup %1550 }
 0xa7d   :  { %v1553_v4 = vpop.eup %1552  ;;  %v1196_v60 = vpack.c.bf16 %v1551_v59, %v1547_v57 }
 0xa7e   :  { %v1197_v61 = vpack.c.bf16 %v1553_v4, %v1549_v58 }
 0xa80   :  { %1200 = vmatprep.subr.bf16.mxu1 %v1197_v61 }
 0xa81   :  { %1201 = vmatpush1.bf16.msra.mxu1 %v1196_v60 }
 0xa82   :  { %v1555_v62 = vpop.eup %1554 }
 0xa83   :  { %v1557_v1 = vpop.eup %1556 }
 0xa84   :  { %v1559_v8 = vpop.eup %1558 }
 0xa85   :  { %v1561_v63 = vpop.eup %1560  ;;  %v1198_v0 = vpack.c.bf16 %v1559_v8, %v1555_v62 }
 0xa86   :  { %v1199_v12 = vpack.c.bf16 %v1561_v63, %v1557_v1 }
 0xa88   :  { %1202 = vmatprep.subr.bf16.mxu1 %v1199_v12 }
 0xa89   :  { %1203 = vmatpush1.bf16.msra.mxu1 %v1198_v0 }
 0xa8c   :  { %1370 = vmatmul.mubr.msk.bf16.vlgmr.msra.gmra.mrb[48].mxu1 %vm232_vm2, %v1786_v32 }
 0xa8d   :  { %1242 = vmatprep.mubr.bf16.mxu1 %v1603_v5 }
 0xa94   :  { %1371 = vmatmul.mubr.msk.bf16.gmra.mrb[52].mxu1 %vm232_vm2, %v1794_v33 }
 0xb5f   :  { %v1234_v9 = vpop.f32.mrb[48].mxu1 }
 0xb60   :  { %v1235_v3 = vadd.f32 %v1234_v9, %v1799_v34  ;;  %v1236_v2 = vpop.f32.mrb[49].mxu1 }
 0xb61   :  { %v1237_v6 = vadd.f32 %v1236_v2, %v1799_v34  ;;  %v1238_v15 = vpop.f32.mrb[50].mxu1 }
 0xb62   :  { %1562 = vtanh.f32 %v1235_v3  ;;  %v1239_v7 = vadd.f32 %v1238_v15, %v1802_v39  ;;  %v1240_v10 = vpop.f32.mrb[51].mxu1 }
 0xb63   :  { %1564 = vtanh.f32 %v1237_v6  ;;  %v1241_v11 = vadd.f32 %v1240_v10, %v1802_v39 }
 0xb64   :  { %1566 = vtanh.f32 %v1239_v7 }
 0xb65   :  { %1568 = vtanh.f32 %v1241_v11 }
 0xb67   :  { %v1244_v5 = vpop.f32.mrb[52].mxu1 }
 0xb68   :  { %v1245_v32 = vadd.f32 %v1244_v5, %v1807_v45  ;;  %v1246_v33 = vpop.f32.mrb[53].mxu1 }
 0xb69   :  { %v1247_v13 = vadd.f32 %v1246_v33, %v1807_v45  ;;  %v1248_v14 = vpop.f32.mrb[54].mxu1 }
 0xb6a   :  { %1570 = vtanh.f32 %v1245_v32  ;;  %v1249_v34 = vadd.f32 %v1248_v14, %v1810_v49  ;;  %v1250_v16 = vpop.f32.mrb[55].mxu1 }
 0xb6b   :  { %1572 = vtanh.f32 %v1247_v13  ;;  %v1251_v19 = vadd.f32 %v1250_v16, %v1810_v49 }
 0xb6c   :  { %v1563_v21 = vpop.eup %1562  ;;  %1574 = vtanh.f32 %v1249_v34 }
 0xb6d   :  { %v1565_v20 = vpop.eup %1564  ;;  %1576 = vtanh.f32 %v1251_v19 }
 0xb6e   :  { %v1567_v39 = vpop.eup %1566 }
 0xb6f   :  { %v1569_v22 = vpop.eup %1568  ;;  %v1261_v23 = vpack.c.bf16 %v1567_v39, %v1563_v21 }
 0xb70   :  { %v1262_v24 = vpack.c.bf16 %v1569_v22, %v1565_v20 }
 0xb72   :  { %1265 = vmatprep.subr.bf16.mxu0 %v1262_v24 }
 0xb73   :  { %1266 = vmatpush1.bf16.msra.mxu0 %v1261_v23 }
 0xb74   :  { %v1571_v26 = vpop.eup %1570 }
 0xb75   :  { %v1573_v45 = vpop.eup %1572 }
 0xb76   :  { %v1575_v25 = vpop.eup %1574 }
 0xb77   :  { %v1577_v27 = vpop.eup %1576  ;;  %v1263_v28 = vpack.c.bf16 %v1575_v25, %v1571_v26 }
 0xb78   :  { %v1264_v29 = vpack.c.bf16 %v1577_v27, %v1573_v45 }
 0xb7a   :  { %1267 = vmatprep.subr.bf16.mxu0 %v1264_v29 }
 0xb7b   :  { %1268 = vmatpush1.bf16.msra.mxu0 %v1263_v28 }
 0xb7e   :  { %1372 = vmatmul.mubr.msk.bf16.vlgmr.msra.gmra.mrb[52].mxu0 %vm232_vm2, %v1821_v17 }
 0xc51   :  { %v1299_v49 = vpop.f32.mrb[52].mxu0 }
 0xc52   :  { %v1300_v30 = vadd.f32 %v1299_v49, %v1840_v18  ;;  %v1301_v31 = vpop.f32.mrb[53].mxu0 }
 0xc53   :  { %v1302_v35 = vadd.f32 %v1301_v31, %v1840_v18  ;;  %v1303_v37 = vpop.f32.mrb[54].mxu0 }
 0xc54   :  { %v1304_v38 = vpop.f32.mrb[55].mxu0 }
 0xc55   :  { %v1308_v36 = vcombine.low %v1300_v30, %v1302_v35 }
 0xc57   :  { %1310 = vst [vmem:[#allocation2 + $0x18] sm:$0x77] %v1308_v36 }
 0xc58   :  { %1589 = shalt.err (!%p1586_p4)
}
 0xc59   :  { %s1590_s14 = scalar_lea.hbm %s2020_s9, 512 }
 0xc5a   :  { %p1591_p5 = scmp.ne.s32.totalorder %s2020_s9, %s1590_s14  ;;  %p1594_p6 = scmp.lt.u32.totalorder %s1590_s14, %s2020_s9 }
 0xc5c   :  { %p1596_p7 = pnand %p1594_p6, %p1591_p5 }
 0xc5e   :  { %1599 = shalt.err (!%p1596_p7)
}
 0xc5f   :  { %1320 = dma.vmem_to_hbm [thread:$0]  %s1318_s10, 512, %s2020_s9, [#allocation3]  }
 0xc60   :  { %1600 = dma.done.wait [#allocation3], 512  }
 0xc61   :  { %1601 = vsyncadd [#allocation3], 4294966784 }
 0xc62   :  { %1324 = vsyncpa [#allocation3], 1 }

</bundles_post_ra>
